<compile_context>
chip_gen: v7x
topology: tpu7x:2x2x1
jax: 0.10.0
libtpu: 0.0.40
codegen_flags: <defaults>
</compile_context>

<pallas_src>
import functools

import jax
import jax.numpy as jnp
import numpy as np
from jax.experimental import pallas as pl
from jax.experimental.pallas import tpu as pltpu


def _qgru_kernel(T, B, I, H, NQ_Z, NQ_R, NQ_G,
                 x_ref, w_in_ref, wo_zr_ref, wo_g_ref, b_in_ref, b_out_ref,
                 out_ref):
    """Single-invocation QGRU forward.

    x_ref:     (T*B, I)        time-major inputs, flattened over (T, B)
    w_in_ref:  (H+I, 12)       fused qin weights, columns [z(5) | r(3) | g(4)]
    wo_zr_ref: (8, 2H)         block-diagonal qout for z (rows 0:5) and r (rows 5:8)
    wo_g_ref:  (4, H)          qout for candidate gate
    b_in_ref:  (1, 12)         fused qin biases
    b_out_ref: (1, 3H)         [bz_out | br_out | bg_out]
    out_ref:   (B, T*H)        lane-dense hidden sequence, column block t*H:(t+1)*H = step t
    """
    NQ_ZR = NQ_Z + NQ_R
    NQ_ALL = NQ_ZR + NQ_G

    # Hoisted weight loads (resident in VMEM; loaded to vregs once).
    wh_zr = w_in_ref[0:H, 0:NQ_ZR]            # (H, 8)   h-side qin for z,r
    wh_g = w_in_ref[0:H, NQ_ZR:NQ_ALL]        # (H, 4)   h-side qin for g (applied to r*h)
    wx_all = w_in_ref[H:H + I, 0:NQ_ALL]      # (I, 12)  x-side qin for all gates
    wo_zr = wo_zr_ref[...]                    # (8, 2H)
    wo_g = wo_g_ref[...]                      # (4, H)
    b_zr_o = b_out_ref[:, 0:2 * H]            # (1, 2H)
    b_g_o = b_out_ref[:, 2 * H:3 * H]         # (1, H)

    # x-side qin pre-activations for every timestep & gate in one matmul.
    xw_all = (jnp.dot(x_ref[...], wx_all, preferred_element_type=jnp.float32)
              + b_in_ref[...])                # (T*B, 12)

    # TODO(synk): the variational quantum circuit (H/RY/U1-U3/CZ gates +
    # measurement, parameterized by `angles`) between qin and qout has no
    # Pallas equivalent; qin activations pass straight to qout.

    h = jnp.zeros((B, H), jnp.float32)        # zero init state (base-class forward)
    hs = []
    for t in range(T):                        # T is small & static -> fully unrolled
        xw_t = xw_all[t * B:(t + 1) * B, :]   # (B, 12) static sublane-aligned slice

        # update + reset gates: one fused qin matmul, one block-diag qout
        # matmul, one sigmoid over 2H lanes.
        q_zr = (jnp.dot(h, wh_zr, preferred_element_type=jnp.float32)
                + xw_t[:, 0:NQ_ZR])                                   # (B, 8)
        zr = jax.nn.sigmoid(
            jnp.dot(q_zr, wo_zr, preferred_element_type=jnp.float32) + b_zr_o)  # (B, 2H)
        z = zr[:, 0:H]
        r = zr[:, H:2 * H]

        # candidate gate (depends on r, so it stays separate).
        q_g = (jnp.dot(r * h, wh_g, preferred_element_type=jnp.float32)
               + xw_t[:, NQ_ZR:NQ_ALL])                               # (B, 4)
        g = jnp.tanh(
            jnp.dot(q_g, wo_g, preferred_element_type=jnp.float32) + b_g_o)     # (B, H)

        h = z * g + (1.0 - z) * h
        hs.append(h)

    # One lane-dense (B, T*H) store; HBM writeback is a single contiguous DMA.
    out_ref[...] = jnp.concatenate(hs, axis=1)


def pack_params(params, input_size, hidden_size):
    """Fuse the 15 per-gate arrays into 5 dense arrays for the kernel."""
    H, I = hidden_size, input_size
    nq_z = params["wz_o"].shape[0]   # 5
    nq_r = params["wr_o"].shape[0]   # 3

    # qin weights: rows 0..H-1 are the h-side, rows H..H+I-1 the x-side;
    # columns grouped [z | r | g].
    w_in = jnp.concatenate([
        jnp.concatenate([params["wz_h"], params["wr_h"], params["wg_h"]], axis=1),
        jnp.concatenate([params["wz_x"], params["wr_x"], params["wg_x"]], axis=1),
    ], axis=0)                                                      # (H+I, 12)
    b_in = jnp.concatenate([params["bz_i"], params["br_i"], params["bg_i"]],
                           axis=1)                                  # (1, 12)

    # Block-diagonal qout for z/r so one matmul + one sigmoid yields both.
    w_zr_o = jnp.zeros((nq_z + nq_r, 2 * H), jnp.float32)
    w_zr_o = w_zr_o.at[:nq_z, :H].set(params["wz_o"])
    w_zr_o = w_zr_o.at[nq_z:, H:].set(params["wr_o"])               # (8, 2H)

    w_g_o = params["wg_o"]                                          # (4, H)
    b_out = jnp.concatenate([params["bz_o"], params["br_o"], params["bg_o"]],
                            axis=1)                                 # (1, 3H)
    return w_in, w_zr_o, w_g_o, b_in, b_out


def qgru_forward(x, params):
    """x: (T, B, I) float32. Returns (hidden_sequence (T,B,H), (h_t, c_t))."""
    T, B, I = x.shape
    H = params["wz_o"].shape[1]
    nq_z = params["wz_o"].shape[0]
    nq_r = params["wr_o"].shape[0]
    nq_g = params["wg_o"].shape[0]
    nq_zr, nq_all = nq_z + nq_r, nq_z + nq_r + nq_g

    w_in, w_zr_o, w_g_o, b_in, b_out = pack_params(params, I, H)
    x2d = x.reshape(T * B, I).astype(jnp.float32)

    kernel = functools.partial(_qgru_kernel, T, B, I, H, nq_z, nq_r, nq_g)

    flops = int(
        2 * T * B * I * nq_all                       # hoisted x-side qin
        + T * (2 * B * H * nq_zr                     # h @ Wh_zr
               + 2 * B * nq_zr * 2 * H               # q_zr @ W_zr_out (block-diag)
               + 2 * B * H * nq_g                    # (r*h) @ Wh_g
               + 2 * B * nq_g * H                    # q_g @ W_g_out
               + 6 * B * H))                         # gating elementwise
    transcendentals = int(T * B * 3 * H)
    bytes_accessed = int(4 * (x2d.size + B * T * H + w_in.size + w_zr_o.size
                              + w_g_o.size + b_in.size + b_out.size))

    vmem_spec = pl.BlockSpec(memory_space=pltpu.MemorySpace.VMEM)

    # NOTE(v7x): for large B, add a leading batch grid axis marked "parallel"
    # to shard independent sequences across the 2 TensorCores; pointless at B=8.
    out = pl.pallas_call(
        kernel,
        out_shape=jax.ShapeDtypeStruct((B, T * H), jnp.float32),
        in_specs=[vmem_spec] * 6,
        out_specs=vmem_spec,
        cost_estimate=pl.CostEstimate(flops=flops,
                                      transcendentals=transcendentals,
                                      bytes_accessed=bytes_accessed),
    )(x2d, w_in, w_zr_o, w_g_o, b_in, b_out)

    hseq = out.reshape(B, T, H).transpose(1, 0, 2).astype(x.dtype)  # (T, B, H)
    h_t = hseq[-1:]                  # (1, B, H) -- matches torch h_t shape
    c_t = jnp.zeros_like(h_t)        # c_t is never updated in QGRU.forward
    return hseq, (h_t, c_t)


def qgru_ref(x, params):
    """Pure-JAX reference (lax.scan) on the UNFUSED params; validates both the
    parameter packing and the kernel math."""
    T, B, I = x.shape
    H = params["wz_o"].shape[1]

    def qlayer(h_part, xt, wh, wx, bi, wo, bo):
        q = h_part @ wh + xt @ wx + bi
        return q @ wo + bo

    def step(h, xt):
        p = params
        z = jax.nn.sigmoid(qlayer(h, xt, p["wz_h"], p["wz_x"], p["bz_i"], p["wz_o"], p["bz_o"]))
        r = jax.nn.sigmoid(qlayer(h, xt, p["wr_h"], p["wr_x"], p["br_i"], p["wr_o"], p["br_o"]))
        g = jnp.tanh(qlayer(r * h, xt, p["wg_h"], p["wg_x"], p["bg_i"], p["wg_o"], p["bg_o"]))
        hn = z * g + (1.0 - z) * h
        return hn, hn

    h0 = jnp.zeros((B, H), jnp.float32)
    _, hseq = jax.lax.scan(step, h0, x)
    return hseq


def init_params(key, input_size, hidden_size):
    """Deterministic init mirroring nn.Linear's uniform(-1/sqrt(fan_in), ..)."""
    H, I = hidden_size, input_size

    def linear_init(k, fan_in, fan_out):
        k1, k2 = jax.random.split(k)
        bound = 1.0 / np.sqrt(fan_in)
        w = jax.random.uniform(k1, (fan_in, fan_out), jnp.float32, -bound, bound)
        b = jax.random.uniform(k2, (1, fan_out), jnp.float32, -bound, bound)
        return w, b

    # update_circuit: n_qubits=5 ; reset_circuit: n_qubits=3 ; candidate: n_qubits=4
    gate_specs = [("z", 5), ("r", 3), ("g", 4)]
    params = {}
    keys = jax.random.split(key, len(gate_specs))
    for (name, nq), k in zip(gate_specs, keys):
        k1, k2 = jax.random.split(k)
        w_in, b_in = linear_init(k1, H + I, nq)     # qin: (H+I) -> nq, cat order [h, x]
        w_out, b_out = linear_init(k2, nq, H)       # qout: nq -> H
        params[f"w{name}_h"] = w_in[:H]
        params[f"w{name}_x"] = w_in[H:]
        params[f"b{name}_i"] = b_in
        params[f"w{name}_o"] = w_out
        params[f"b{name}_o"] = b_out
        # NOTE: `angles` Parameter(n_layers+1, degree, n_qubits) only feeds the
        # (skipped) quantum circuit, so it is not materialized here.
    return params


if __name__ == "__main__":
    T, B, I, H = 8, 8, 4, 32    # seq=8, batch=8, input_size=4, hidden_size=32
    key = jax.random.PRNGKey(0)
    kx, kp = jax.random.split(key)
    x = jax.random.normal(kx, (T, B, I), dtype=jnp.float32)
    params = init_params(kp, I, H)

    hseq, (h_t, c_t) = qgru_forward(x, params)
    jax.block_until_ready((hseq, h_t, c_t))

    ref = qgru_ref(x, params)
    np.testing.assert_allclose(np.asarray(hseq), np.asarray(ref),
                               rtol=1e-5, atol=1e-5)
    assert hseq.shape == (T, B, H) and h_t.shape == (1, B, H) and c_t.shape == (1, B, H)
    print("KERNEL_OK")
</pallas_src>

<mosaic_0001>
module attributes {stable_mosaic.version = 11 : i64} {
  func.func @_qgru_kernel(%arg0: memref<64x4xf32, #tpu.memory_space<vmem>>, %arg1: memref<36x12xf32, #tpu.memory_space<vmem>>, %arg2: memref<8x64xf32, #tpu.memory_space<vmem>>, %arg3: memref<4x32xf32, #tpu.memory_space<vmem>>, %arg4: memref<1x12xf32, #tpu.memory_space<vmem>>, %arg5: memref<1x96xf32, #tpu.memory_space<vmem>>, %arg6: memref<8x256xf32, #tpu.memory_space<vmem>>) attributes {dimension_semantics = [], scalar_prefetch = 0 : i64, scratch_operands = 0 : i64, tpu.core_type = #tpu.core_type<tc>} {
    %c0 = arith.constant 0 : index
    %c0_0 = arith.constant 0 : index
    %0 = vector.load %arg1[%c0, %c0_0] : memref<36x12xf32, #tpu.memory_space<vmem>>, vector<32x8xf32>
    %c0_1 = arith.constant 0 : index
    %c8 = arith.constant 8 : index
    %1 = vector.load %arg1[%c0_1, %c8] : memref<36x12xf32, #tpu.memory_space<vmem>>, vector<32x4xf32>
    %c32 = arith.constant 32 : index
    %c0_2 = arith.constant 0 : index
    %2 = vector.load %arg1[%c32, %c0_2] : memref<36x12xf32, #tpu.memory_space<vmem>>, vector<4x12xf32>
    %c0_3 = arith.constant 0 : index
    %c0_4 = arith.constant 0 : index
    %3 = vector.load %arg2[%c0_3, %c0_4] : memref<8x64xf32, #tpu.memory_space<vmem>>, vector<8x64xf32>
    %c0_5 = arith.constant 0 : index
    %c0_6 = arith.constant 0 : index
    %4 = vector.load %arg3[%c0_5, %c0_6] : memref<4x32xf32, #tpu.memory_space<vmem>>, vector<4x32xf32>
    %c0_7 = arith.constant 0 : index
    %c0_8 = arith.constant 0 : index
    %5 = vector.load %arg5[%c0_7, %c0_8] : memref<1x96xf32, #tpu.memory_space<vmem>>, vector<1x64xf32>
    %c0_9 = arith.constant 0 : index
    %c64 = arith.constant 64 : index
    %6 = vector.load %arg5[%c0_9, %c64] : memref<1x96xf32, #tpu.memory_space<vmem>>, vector<1x32xf32>
    %c0_10 = arith.constant 0 : index
    %c0_11 = arith.constant 0 : index
    %7 = vector.load %arg0[%c0_10, %c0_11] : memref<64x4xf32, #tpu.memory_space<vmem>>, vector<64x4xf32>
    %cst = arith.constant dense<0.000000e+00> : vector<64x12xf32>
    %8 = tpu.matmul %7, %2, %cst {dimension_numbers = #tpu.dot_dimension_numbers<[1], [0], [0], [1], [0, 0, 1, 1], [], []>} : vector<64x4xf32>, vector<4x12xf32>, vector<64x12xf32> -> vector<64x12xf32>
    %c0_12 = arith.constant 0 : index
    %c0_13 = arith.constant 0 : index
    %9 = vector.load %arg4[%c0_12, %c0_13] : memref<1x12xf32, #tpu.memory_space<vmem>>, vector<1x12xf32>
    %10 = vector.broadcast %9 : vector<1x12xf32> to vector<64x12xf32>
    %11 = arith.addf %8, %10 : vector<64x12xf32>
    %cst_14 = arith.constant 0.000000e+00 : f32
    %12 = vector.broadcast %cst_14 : f32 to vector<8x32xf32>
    %13 = vector.extract_strided_slice %11 {offsets = [0, 0], sizes = [8, 12], strides = [1, 1]} : vector<64x12xf32> to vector<8x12xf32>
    %cst_15 = arith.constant dense<0.000000e+00> : vector<8x8xf32>
    %14 = tpu.matmul %12, %0, %cst_15 {dimension_numbers = #tpu.dot_dimension_numbers<[1], [0], [0], [1], [0, 0, 1, 1], [], []>} : vector<8x32xf32>, vector<32x8xf32>, vector<8x8xf32> -> vector<8x8xf32>
    %15 = vector.extract_strided_slice %13 {offsets = [0, 0], sizes = [8, 8], strides = [1, 1]} : vector<8x12xf32> to vector<8x8xf32>
    %16 = arith.addf %14, %15 : vector<8x8xf32>
    %cst_16 = arith.constant dense<0.000000e+00> : vector<8x64xf32>
    %17 = tpu.matmul %16, %3, %cst_16 {dimension_numbers = #tpu.dot_dimension_numbers<[1], [0], [0], [1], [0, 0, 1, 1], [], []>} : vector<8x8xf32>, vector<8x64xf32>, vector<8x64xf32> -> vector<8x64xf32>
    %18 = vector.broadcast %5 : vector<1x64xf32> to vector<8x64xf32>
    %19 = arith.addf %17, %18 : vector<8x64xf32>
    %20 = arith.negf %19 : vector<8x64xf32>
    %21 = math.exp %20 : vector<8x64xf32>
    %cst_17 = arith.constant 1.000000e+00 : f32
    %22 = vector.broadcast %cst_17 : f32 to vector<8x64xf32>
    %23 = arith.addf %22, %21 : vector<8x64xf32>
    %24 = arith.divf %22, %23 : vector<8x64xf32>
    %25 = vector.extract_strided_slice %24 {offsets = [0, 0], sizes = [8, 32], strides = [1, 1]} : vector<8x64xf32> to vector<8x32xf32>
    %26 = vector.extract_strided_slice %24 {offsets = [0, 32], sizes = [8, 32], strides = [1, 1]} : vector<8x64xf32> to vector<8x32xf32>
    %27 = arith.mulf %26, %12 : vector<8x32xf32>
    %cst_18 = arith.constant dense<0.000000e+00> : vector<8x4xf32>
    %28 = tpu.matmul %27, %1, %cst_18 {dimension_numbers = #tpu.dot_dimension_numbers<[1], [0], [0], [1], [0, 0, 1, 1], [], []>} : vector<8x32xf32>, vector<32x4xf32>, vector<8x4xf32> -> vector<8x4xf32>
    %29 = vector.extract_strided_slice %13 {offsets = [0, 8], sizes = [8, 4], strides = [1, 1]} : vector<8x12xf32> to vector<8x4xf32>
    %30 = arith.addf %28, %29 : vector<8x4xf32>
    %cst_19 = arith.constant dense<0.000000e+00> : vector<8x32xf32>
    %31 = tpu.matmul %30, %4, %cst_19 {dimension_numbers = #tpu.dot_dimension_numbers<[1], [0], [0], [1], [0, 0, 1, 1], [], []>} : vector<8x4xf32>, vector<4x32xf32>, vector<8x32xf32> -> vector<8x32xf32>
    %32 = vector.broadcast %6 : vector<1x32xf32> to vector<8x32xf32>
    %33 = arith.addf %31, %32 : vector<8x32xf32>
    %34 = math.tanh %33 : vector<8x32xf32>
    %35 = arith.mulf %25, %34 : vector<8x32xf32>
    %cst_20 = arith.constant 1.000000e+00 : f32
    %36 = vector.broadcast %cst_20 : f32 to vector<8x32xf32>
    %37 = arith.subf %36, %25 : vector<8x32xf32>
    %38 = arith.mulf %37, %12 : vector<8x32xf32>
    %39 = arith.addf %35, %38 : vector<8x32xf32>
    %40 = vector.extract_strided_slice %11 {offsets = [8, 0], sizes = [8, 12], strides = [1, 1]} : vector<64x12xf32> to vector<8x12xf32>
    %cst_21 = arith.constant dense<0.000000e+00> : vector<8x8xf32>
    %41 = tpu.matmul %39, %0, %cst_21 {dimension_numbers = #tpu.dot_dimension_numbers<[1], [0], [0], [1], [0, 0, 1, 1], [], []>} : vector<8x32xf32>, vector<32x8xf32>, vector<8x8xf32> -> vector<8x8xf32>
    %42 = vector.extract_strided_slice %40 {offsets = [0, 0], sizes = [8, 8], strides = [1, 1]} : vector<8x12xf32> to vector<8x8xf32>
    %43 = arith.addf %41, %42 : vector<8x8xf32>
    %cst_22 = arith.constant dense<0.000000e+00> : vector<8x64xf32>
    %44 = tpu.matmul %43, %3, %cst_22 {dimension_numbers = #tpu.dot_dimension_numbers<[1], [0], [0], [1], [0, 0, 1, 1], [], []>} : vector<8x8xf32>, vector<8x64xf32>, vector<8x64xf32> -> vector<8x64xf32>
    %45 = vector.broadcast %5 : vector<1x64xf32> to vector<8x64xf32>
    %46 = arith.addf %44, %45 : vector<8x64xf32>
    %47 = arith.negf %46 : vector<8x64xf32>
    %48 = math.exp %47 : vector<8x64xf32>
    %cst_23 = arith.constant 1.000000e+00 : f32
    %49 = vector.broadcast %cst_23 : f32 to vector<8x64xf32>
    %50 = arith.addf %49, %48 : vector<8x64xf32>
    %51 = arith.divf %49, %50 : vector<8x64xf32>
    %52 = vector.extract_strided_slice %51 {offsets = [0, 0], sizes = [8, 32], strides = [1, 1]} : vector<8x64xf32> to vector<8x32xf32>
    %53 = vector.extract_strided_slice %51 {offsets = [0, 32], sizes = [8, 32], strides = [1, 1]} : vector<8x64xf32> to vector<8x32xf32>
    %54 = arith.mulf %53, %39 : vector<8x32xf32>
    %cst_24 = arith.constant dense<0.000000e+00> : vector<8x4xf32>
    %55 = tpu.matmul %54, %1, %cst_24 {dimension_numbers = #tpu.dot_dimension_numbers<[1], [0], [0], [1], [0, 0, 1, 1], [], []>} : vector<8x32xf32>, vector<32x4xf32>, vector<8x4xf32> -> vector<8x4xf32>
    %56 = vector.extract_strided_slice %40 {offsets = [0, 8], sizes = [8, 4], strides = [1, 1]} : vector<8x12xf32> to vector<8x4xf32>
    %57 = arith.addf %55, %56 : vector<8x4xf32>
    %cst_25 = arith.constant dense<0.000000e+00> : vector<8x32xf32>
    %58 = tpu.matmul %57, %4, %cst_25 {dimension_numbers = #tpu.dot_dimension_numbers<[1], [0], [0], [1], [0, 0, 1, 1], [], []>} : vector<8x4xf32>, vector<4x32xf32>, vector<8x32xf32> -> vector<8x32xf32>
    %59 = vector.broadcast %6 : vector<1x32xf32> to vector<8x32xf32>
    %60 = arith.addf %58, %59 : vector<8x32xf32>
    %61 = math.tanh %60 : vector<8x32xf32>
    %62 = arith.mulf %52, %61 : vector<8x32xf32>
    %cst_26 = arith.constant 1.000000e+00 : f32
    %63 = vector.broadcast %cst_26 : f32 to vector<8x32xf32>
    %64 = arith.subf %63, %52 : vector<8x32xf32>
    %65 = arith.mulf %64, %39 : vector<8x32xf32>
    %66 = arith.addf %62, %65 : vector<8x32xf32>
    %67 = vector.extract_strided_slice %11 {offsets = [16, 0], sizes = [8, 12], strides = [1, 1]} : vector<64x12xf32> to vector<8x12xf32>
    %cst_27 = arith.constant dense<0.000000e+00> : vector<8x8xf32>
    %68 = tpu.matmul %66, %0, %cst_27 {dimension_numbers = #tpu.dot_dimension_numbers<[1], [0], [0], [1], [0, 0, 1, 1], [], []>} : vector<8x32xf32>, vector<32x8xf32>, vector<8x8xf32> -> vector<8x8xf32>
    %69 = vector.extract_strided_slice %67 {offsets = [0, 0], sizes = [8, 8], strides = [1, 1]} : vector<8x12xf32> to vector<8x8xf32>
    %70 = arith.addf %68, %69 : vector<8x8xf32>
    %cst_28 = arith.constant dense<0.000000e+00> : vector<8x64xf32>
    %71 = tpu.matmul %70, %3, %cst_28 {dimension_numbers = #tpu.dot_dimension_numbers<[1], [0], [0], [1], [0, 0, 1, 1], [], []>} : vector<8x8xf32>, vector<8x64xf32>, vector<8x64xf32> -> vector<8x64xf32>
    %72 = vector.broadcast %5 : vector<1x64xf32> to vector<8x64xf32>
    %73 = arith.addf %71, %72 : vector<8x64xf32>
    %74 = arith.negf %73 : vector<8x64xf32>
    %75 = math.exp %74 : vector<8x64xf32>
    %cst_29 = arith.constant 1.000000e+00 : f32
    %76 = vector.broadcast %cst_29 : f32 to vector<8x64xf32>
    %77 = arith.addf %76, %75 : vector<8x64xf32>
    %78 = arith.divf %76, %77 : vector<8x64xf32>
    %79 = vector.extract_strided_slice %78 {offsets = [0, 0], sizes = [8, 32], strides = [1, 1]} : vector<8x64xf32> to vector<8x32xf32>
    %80 = vector.extract_strided_slice %78 {offsets = [0, 32], sizes = [8, 32], strides = [1, 1]} : vector<8x64xf32> to vector<8x32xf32>
    %81 = arith.mulf %80, %66 : vector<8x32xf32>
    %cst_30 = arith.constant dense<0.000000e+00> : vector<8x4xf32>
    %82 = tpu.matmul %81, %1, %cst_30 {dimension_numbers = #tpu.dot_dimension_numbers<[1], [0], [0], [1], [0, 0, 1, 1], [], []>} : vector<8x32xf32>, vector<32x4xf32>, vector<8x4xf32> -> vector<8x4xf32>
    %83 = vector.extract_strided_slice %67 {offsets = [0, 8], sizes = [8, 4], strides = [1, 1]} : vector<8x12xf32> to vector<8x4xf32>
    %84 = arith.addf %82, %83 : vector<8x4xf32>
    %cst_31 = arith.constant dense<0.000000e+00> : vector<8x32xf32>
    %85 = tpu.matmul %84, %4, %cst_31 {dimension_numbers = #tpu.dot_dimension_numbers<[1], [0], [0], [1], [0, 0, 1, 1], [], []>} : vector<8x4xf32>, vector<4x32xf32>, vector<8x32xf32> -> vector<8x32xf32>
    %86 = vector.broadcast %6 : vector<1x32xf32> to vector<8x32xf32>
    %87 = arith.addf %85, %86 : vector<8x32xf32>
    %88 = math.tanh %87 : vector<8x32xf32>
    %89 = arith.mulf %79, %88 : vector<8x32xf32>
    %cst_32 = arith.constant 1.000000e+00 : f32
    %90 = vector.broadcast %cst_32 : f32 to vector<8x32xf32>
    %91 = arith.subf %90, %79 : vector<8x32xf32>
    %92 = arith.mulf %91, %66 : vector<8x32xf32>
    %93 = arith.addf %89, %92 : vector<8x32xf32>
    %94 = vector.extract_strided_slice %11 {offsets = [24, 0], sizes = [8, 12], strides = [1, 1]} : vector<64x12xf32> to vector<8x12xf32>
    %cst_33 = arith.constant dense<0.000000e+00> : vector<8x8xf32>
    %95 = tpu.matmul %93, %0, %cst_33 {dimension_numbers = #tpu.dot_dimension_numbers<[1], [0], [0], [1], [0, 0, 1, 1], [], []>} : vector<8x32xf32>, vector<32x8xf32>, vector<8x8xf32> -> vector<8x8xf32>
    %96 = vector.extract_strided_slice %94 {offsets = [0, 0], sizes = [8, 8], strides = [1, 1]} : vector<8x12xf32> to vector<8x8xf32>
    %97 = arith.addf %95, %96 : vector<8x8xf32>
    %cst_34 = arith.constant dense<0.000000e+00> : vector<8x64xf32>
    %98 = tpu.matmul %97, %3, %cst_34 {dimension_numbers = #tpu.dot_dimension_numbers<[1], [0], [0], [1], [0, 0, 1, 1], [], []>} : vector<8x8xf32>, vector<8x64xf32>, vector<8x64xf32> -> vector<8x64xf32>
    %99 = vector.broadcast %5 : vector<1x64xf32> to vector<8x64xf32>
    %100 = arith.addf %98, %99 : vector<8x64xf32>
    %101 = arith.negf %100 : vector<8x64xf32>
    %102 = math.exp %101 : vector<8x64xf32>
    %cst_35 = arith.constant 1.000000e+00 : f32
    %103 = vector.broadcast %cst_35 : f32 to vector<8x64xf32>
    %104 = arith.addf %103, %102 : vector<8x64xf32>
    %105 = arith.divf %103, %104 : vector<8x64xf32>
    %106 = vector.extract_strided_slice %105 {offsets = [0, 0], sizes = [8, 32], strides = [1, 1]} : vector<8x64xf32> to vector<8x32xf32>
    %107 = vector.extract_strided_slice %105 {offsets = [0, 32], sizes = [8, 32], strides = [1, 1]} : vector<8x64xf32> to vector<8x32xf32>
    %108 = arith.mulf %107, %93 : vector<8x32xf32>
    %cst_36 = arith.constant dense<0.000000e+00> : vector<8x4xf32>
    %109 = tpu.matmul %108, %1, %cst_36 {dimension_numbers = #tpu.dot_dimension_numbers<[1], [0], [0], [1], [0, 0, 1, 1], [], []>} : vector<8x32xf32>, vector<32x4xf32>, vector<8x4xf32> -> vector<8x4xf32>
    %110 = vector.extract_strided_slice %94 {offsets = [0, 8], sizes = [8, 4], strides = [1, 1]} : vector<8x12xf32> to vector<8x4xf32>
    %111 = arith.addf %109, %110 : vector<8x4xf32>
    %cst_37 = arith.constant dense<0.000000e+00> : vector<8x32xf32>
    %112 = tpu.matmul %111, %4, %cst_37 {dimension_numbers = #tpu.dot_dimension_numbers<[1], [0], [0], [1], [0, 0, 1, 1], [], []>} : vector<8x4xf32>, vector<4x32xf32>, vector<8x32xf32> -> vector<8x32xf32>
    %113 = vector.broadcast %6 : vector<1x32xf32> to vector<8x32xf32>
    %114 = arith.addf %112, %113 : vector<8x32xf32>
    %115 = math.tanh %114 : vector<8x32xf32>
    %116 = arith.mulf %106, %115 : vector<8x32xf32>
    %cst_38 = arith.constant 1.000000e+00 : f32
    %117 = vector.broadcast %cst_38 : f32 to vector<8x32xf32>
    %118 = arith.subf %117, %106 : vector<8x32xf32>
    %119 = arith.mulf %118, %93 : vector<8x32xf32>
    %120 = arith.addf %116, %119 : vector<8x32xf32>
    %121 = vector.extract_strided_slice %11 {offsets = [32, 0], sizes = [8, 12], strides = [1, 1]} : vector<64x12xf32> to vector<8x12xf32>
    %cst_39 = arith.constant dense<0.000000e+00> : vector<8x8xf32>
    %122 = tpu.matmul %120, %0, %cst_39 {dimension_numbers = #tpu.dot_dimension_numbers<[1], [0], [0], [1], [0, 0, 1, 1], [], []>} : vector<8x32xf32>, vector<32x8xf32>, vector<8x8xf32> -> vector<8x8xf32>
    %123 = vector.extract_strided_slice %121 {offsets = [0, 0], sizes = [8, 8], strides = [1, 1]} : vector<8x12xf32> to vector<8x8xf32>
    %124 = arith.addf %122, %123 : vector<8x8xf32>
    %cst_40 = arith.constant dense<0.000000e+00> : vector<8x64xf32>
    %125 = tpu.matmul %124, %3, %cst_40 {dimension_numbers = #tpu.dot_dimension_numbers<[1], [0], [0], [1], [0, 0, 1, 1], [], []>} : vector<8x8xf32>, vector<8x64xf32>, vector<8x64xf32> -> vector<8x64xf32>
    %126 = vector.broadcast %5 : vector<1x64xf32> to vector<8x64xf32>
    %127 = arith.addf %125, %126 : vector<8x64xf32>
    %128 = arith.negf %127 : vector<8x64xf32>
    %129 = math.exp %128 : vector<8x64xf32>
    %cst_41 = arith.constant 1.000000e+00 : f32
    %130 = vector.broadcast %cst_41 : f32 to vector<8x64xf32>
    %131 = arith.addf %130, %129 : vector<8x64xf32>
    %132 = arith.divf %130, %131 : vector<8x64xf32>
    %133 = vector.extract_strided_slice %132 {offsets = [0, 0], sizes = [8, 32], strides = [1, 1]} : vector<8x64xf32> to vector<8x32xf32>
    %134 = vector.extract_strided_slice %132 {offsets = [0, 32], sizes = [8, 32], strides = [1, 1]} : vector<8x64xf32> to vector<8x32xf32>
    %135 = arith.mulf %134, %120 : vector<8x32xf32>
    %cst_42 = arith.constant dense<0.000000e+00> : vector<8x4xf32>
    %136 = tpu.matmul %135, %1, %cst_42 {dimension_numbers = #tpu.dot_dimension_numbers<[1], [0], [0], [1], [0, 0, 1, 1], [], []>} : vector<8x32xf32>, vector<32x4xf32>, vector<8x4xf32> -> vector<8x4xf32>
    %137 = vector.extract_strided_slice %121 {offsets = [0, 8], sizes = [8, 4], strides = [1, 1]} : vector<8x12xf32> to vector<8x4xf32>
    %138 = arith.addf %136, %137 : vector<8x4xf32>
    %cst_43 = arith.constant dense<0.000000e+00> : vector<8x32xf32>
    %139 = tpu.matmul %138, %4, %cst_43 {dimension_numbers = #tpu.dot_dimension_numbers<[1], [0], [0], [1], [0, 0, 1, 1], [], []>} : vector<8x4xf32>, vector<4x32xf32>, vector<8x32xf32> -> vector<8x32xf32>
    %140 = vector.broadcast %6 : vector<1x32xf32> to vector<8x32xf32>
    %141 = arith.addf %139, %140 : vector<8x32xf32>
    %142 = math.tanh %141 : vector<8x32xf32>
    %143 = arith.mulf %133, %142 : vector<8x32xf32>
    %cst_44 = arith.constant 1.000000e+00 : f32
    %144 = vector.broadcast %cst_44 : f32 to vector<8x32xf32>
    %145 = arith.subf %144, %133 : vector<8x32xf32>
    %146 = arith.mulf %145, %120 : vector<8x32xf32>
    %147 = arith.addf %143, %146 : vector<8x32xf32>
    %148 = vector.extract_strided_slice %11 {offsets = [40, 0], sizes = [8, 12], strides = [1, 1]} : vector<64x12xf32> to vector<8x12xf32>
    %cst_45 = arith.constant dense<0.000000e+00> : vector<8x8xf32>
    %149 = tpu.matmul %147, %0, %cst_45 {dimension_numbers = #tpu.dot_dimension_numbers<[1], [0], [0], [1], [0, 0, 1, 1], [], []>} : vector<8x32xf32>, vector<32x8xf32>, vector<8x8xf32> -> vector<8x8xf32>
    %150 = vector.extract_strided_slice %148 {offsets = [0, 0], sizes = [8, 8], strides = [1, 1]} : vector<8x12xf32> to vector<8x8xf32>
    %151 = arith.addf %149, %150 : vector<8x8xf32>
    %cst_46 = arith.constant dense<0.000000e+00> : vector<8x64xf32>
    %152 = tpu.matmul %151, %3, %cst_46 {dimension_numbers = #tpu.dot_dimension_numbers<[1], [0], [0], [1], [0, 0, 1, 1], [], []>} : vector<8x8xf32>, vector<8x64xf32>, vector<8x64xf32> -> vector<8x64xf32>
    %153 = vector.broadcast %5 : vector<1x64xf32> to vector<8x64xf32>
    %154 = arith.addf %152, %153 : vector<8x64xf32>
    %155 = arith.negf %154 : vector<8x64xf32>
    %156 = math.exp %155 : vector<8x64xf32>
    %cst_47 = arith.constant 1.000000e+00 : f32
    %157 = vector.broadcast %cst_47 : f32 to vector<8x64xf32>
    %158 = arith.addf %157, %156 : vector<8x64xf32>
    %159 = arith.divf %157, %158 : vector<8x64xf32>
    %160 = vector.extract_strided_slice %159 {offsets = [0, 0], sizes = [8, 32], strides = [1, 1]} : vector<8x64xf32> to vector<8x32xf32>
    %161 = vector.extract_strided_slice %159 {offsets = [0, 32], sizes = [8, 32], strides = [1, 1]} : vector<8x64xf32> to vector<8x32xf32>
    %162 = arith.mulf %161, %147 : vector<8x32xf32>
    %cst_48 = arith.constant dense<0.000000e+00> : vector<8x4xf32>
    %163 = tpu.matmul %162, %1, %cst_48 {dimension_numbers = #tpu.dot_dimension_numbers<[1], [0], [0], [1], [0, 0, 1, 1], [], []>} : vector<8x32xf32>, vector<32x4xf32>, vector<8x4xf32> -> vector<8x4xf32>
    %164 = vector.extract_strided_slice %148 {offsets = [0, 8], sizes = [8, 4], strides = [1, 1]} : vector<8x12xf32> to vector<8x4xf32>
    %165 = arith.addf %163, %164 : vector<8x4xf32>
    %cst_49 = arith.constant dense<0.000000e+00> : vector<8x32xf32>
    %166 = tpu.matmul %165, %4, %cst_49 {dimension_numbers = #tpu.dot_dimension_numbers<[1], [0], [0], [1], [0, 0, 1, 1], [], []>} : vector<8x4xf32>, vector<4x32xf32>, vector<8x32xf32> -> vector<8x32xf32>
    %167 = vector.broadcast %6 : vector<1x32xf32> to vector<8x32xf32>
    %168 = arith.addf %166, %167 : vector<8x32xf32>
    %169 = math.tanh %168 : vector<8x32xf32>
    %170 = arith.mulf %160, %169 : vector<8x32xf32>
    %cst_50 = arith.constant 1.000000e+00 : f32
    %171 = vector.broadcast %cst_50 : f32 to vector<8x32xf32>
    %172 = arith.subf %171, %160 : vector<8x32xf32>
    %173 = arith.mulf %172, %147 : vector<8x32xf32>
    %174 = arith.addf %170, %173 : vector<8x32xf32>
    %175 = vector.extract_strided_slice %11 {offsets = [48, 0], sizes = [8, 12], strides = [1, 1]} : vector<64x12xf32> to vector<8x12xf32>
    %cst_51 = arith.constant dense<0.000000e+00> : vector<8x8xf32>
    %176 = tpu.matmul %174, %0, %cst_51 {dimension_numbers = #tpu.dot_dimension_numbers<[1], [0], [0], [1], [0, 0, 1, 1], [], []>} : vector<8x32xf32>, vector<32x8xf32>, vector<8x8xf32> -> vector<8x8xf32>
    %177 = vector.extract_strided_slice %175 {offsets = [0, 0], sizes = [8, 8], strides = [1, 1]} : vector<8x12xf32> to vector<8x8xf32>
    %178 = arith.addf %176, %177 : vector<8x8xf32>
    %cst_52 = arith.constant dense<0.000000e+00> : vector<8x64xf32>
    %179 = tpu.matmul %178, %3, %cst_52 {dimension_numbers = #tpu.dot_dimension_numbers<[1], [0], [0], [1], [0, 0, 1, 1], [], []>} : vector<8x8xf32>, vector<8x64xf32>, vector<8x64xf32> -> vector<8x64xf32>
    %180 = vector.broadcast %5 : vector<1x64xf32> to vector<8x64xf32>
    %181 = arith.addf %179, %180 : vector<8x64xf32>
    %182 = arith.negf %181 : vector<8x64xf32>
    %183 = math.exp %182 : vector<8x64xf32>
    %cst_53 = arith.constant 1.000000e+00 : f32
    %184 = vector.broadcast %cst_53 : f32 to vector<8x64xf32>
    %185 = arith.addf %184, %183 : vector<8x64xf32>
    %186 = arith.divf %184, %185 : vector<8x64xf32>
    %187 = vector.extract_strided_slice %186 {offsets = [0, 0], sizes = [8, 32], strides = [1, 1]} : vector<8x64xf32> to vector<8x32xf32>
    %188 = vector.extract_strided_slice %186 {offsets = [0, 32], sizes = [8, 32], strides = [1, 1]} : vector<8x64xf32> to vector<8x32xf32>
    %189 = arith.mulf %188, %174 : vector<8x32xf32>
    %cst_54 = arith.constant dense<0.000000e+00> : vector<8x4xf32>
    %190 = tpu.matmul %189, %1, %cst_54 {dimension_numbers = #tpu.dot_dimension_numbers<[1], [0], [0], [1], [0, 0, 1, 1], [], []>} : vector<8x32xf32>, vector<32x4xf32>, vector<8x4xf32> -> vector<8x4xf32>
    %191 = vector.extract_strided_slice %175 {offsets = [0, 8], sizes = [8, 4], strides = [1, 1]} : vector<8x12xf32> to vector<8x4xf32>
    %192 = arith.addf %190, %191 : vector<8x4xf32>
    %cst_55 = arith.constant dense<0.000000e+00> : vector<8x32xf32>
    %193 = tpu.matmul %192, %4, %cst_55 {dimension_numbers = #tpu.dot_dimension_numbers<[1], [0], [0], [1], [0, 0, 1, 1], [], []>} : vector<8x4xf32>, vector<4x32xf32>, vector<8x32xf32> -> vector<8x32xf32>
    %194 = vector.broadcast %6 : vector<1x32xf32> to vector<8x32xf32>
    %195 = arith.addf %193, %194 : vector<8x32xf32>
    %196 = math.tanh %195 : vector<8x32xf32>
    %197 = arith.mulf %187, %196 : vector<8x32xf32>
    %cst_56 = arith.constant 1.000000e+00 : f32
    %198 = vector.broadcast %cst_56 : f32 to vector<8x32xf32>
    %199 = arith.subf %198, %187 : vector<8x32xf32>
    %200 = arith.mulf %199, %174 : vector<8x32xf32>
    %201 = arith.addf %197, %200 : vector<8x32xf32>
    %202 = vector.extract_strided_slice %11 {offsets = [56, 0], sizes = [8, 12], strides = [1, 1]} : vector<64x12xf32> to vector<8x12xf32>
    %cst_57 = arith.constant dense<0.000000e+00> : vector<8x8xf32>
    %203 = tpu.matmul %201, %0, %cst_57 {dimension_numbers = #tpu.dot_dimension_numbers<[1], [0], [0], [1], [0, 0, 1, 1], [], []>} : vector<8x32xf32>, vector<32x8xf32>, vector<8x8xf32> -> vector<8x8xf32>
    %204 = vector.extract_strided_slice %202 {offsets = [0, 0], sizes = [8, 8], strides = [1, 1]} : vector<8x12xf32> to vector<8x8xf32>
    %205 = arith.addf %203, %204 : vector<8x8xf32>
    %cst_58 = arith.constant dense<0.000000e+00> : vector<8x64xf32>
    %206 = tpu.matmul %205, %3, %cst_58 {dimension_numbers = #tpu.dot_dimension_numbers<[1], [0], [0], [1], [0, 0, 1, 1], [], []>} : vector<8x8xf32>, vector<8x64xf32>, vector<8x64xf32> -> vector<8x64xf32>
    %207 = vector.broadcast %5 : vector<1x64xf32> to vector<8x64xf32>
    %208 = arith.addf %206, %207 : vector<8x64xf32>
    %209 = arith.negf %208 : vector<8x64xf32>
    %210 = math.exp %209 : vector<8x64xf32>
    %cst_59 = arith.constant 1.000000e+00 : f32
    %211 = vector.broadcast %cst_59 : f32 to vector<8x64xf32>
    %212 = arith.addf %211, %210 : vector<8x64xf32>
    %213 = arith.divf %211, %212 : vector<8x64xf32>
    %214 = vector.extract_strided_slice %213 {offsets = [0, 0], sizes = [8, 32], strides = [1, 1]} : vector<8x64xf32> to vector<8x32xf32>
    %215 = vector.extract_strided_slice %213 {offsets = [0, 32], sizes = [8, 32], strides = [1, 1]} : vector<8x64xf32> to vector<8x32xf32>
    %216 = arith.mulf %215, %201 : vector<8x32xf32>
    %cst_60 = arith.constant dense<0.000000e+00> : vector<8x4xf32>
    %217 = tpu.matmul %216, %1, %cst_60 {dimension_numbers = #tpu.dot_dimension_numbers<[1], [0], [0], [1], [0, 0, 1, 1], [], []>} : vector<8x32xf32>, vector<32x4xf32>, vector<8x4xf32> -> vector<8x4xf32>
    %218 = vector.extract_strided_slice %202 {offsets = [0, 8], sizes = [8, 4], strides = [1, 1]} : vector<8x12xf32> to vector<8x4xf32>
    %219 = arith.addf %217, %218 : vector<8x4xf32>
    %cst_61 = arith.constant dense<0.000000e+00> : vector<8x32xf32>
    %220 = tpu.matmul %219, %4, %cst_61 {dimension_numbers = #tpu.dot_dimension_numbers<[1], [0], [0], [1], [0, 0, 1, 1], [], []>} : vector<8x4xf32>, vector<4x32xf32>, vector<8x32xf32> -> vector<8x32xf32>
    %221 = vector.broadcast %6 : vector<1x32xf32> to vector<8x32xf32>
    %222 = arith.addf %220, %221 : vector<8x32xf32>
    %223 = math.tanh %222 : vector<8x32xf32>
    %224 = arith.mulf %214, %223 : vector<8x32xf32>
    %cst_62 = arith.constant 1.000000e+00 : f32
    %225 = vector.broadcast %cst_62 : f32 to vector<8x32xf32>
    %226 = arith.subf %225, %214 : vector<8x32xf32>
    %227 = arith.mulf %226, %201 : vector<8x32xf32>
    %228 = arith.addf %224, %227 : vector<8x32xf32>
    %229 = tpu.concatenate %39, %66, %93, %120, %147, %174, %201, %228 in 1 : vector<8x32xf32>, vector<8x32xf32>, vector<8x32xf32>, vector<8x32xf32>, vector<8x32xf32>, vector<8x32xf32>, vector<8x32xf32>, vector<8x32xf32> -> vector<8x256xf32>
    %c0_63 = arith.constant 0 : index
    %c0_64 = arith.constant 0 : index
    %230 = vector.load %arg6[%c0_63, %c0_64] : memref<8x256xf32, #tpu.memory_space<vmem>>, vector<8x256xf32>
    tpu.vector_store %arg6[%c0_63, %c0_64], %229 {strides = array<i32>} : memref<8x256xf32, #tpu.memory_space<vmem>>, vector<8x256xf32>,
    return
  }
}

</mosaic_0001>

<bundles_post_ra>
// kernel: tpu_custom_call.1
= control target key start
LH: loop header
LB: loop body
LE: loop exit
PB: predicated region body
PF: predicated region fallthrough
CT: control target
= control target key end

     0   :  { %vm72_vm0 = vcmask 1043456   ;;  %v3384_v3 = vmov 0.0|0.0   ;;  %vm47_vm1 = vcmask 31744   ;;  %s3832_s0 = inlined_call_operand.vmem [shape: f32[64,4], index: 0, kind: input, shape index: {}]   ;;  %s3833_s1 = inlined_call_operand.vmem [shape: f32[36,12], index: 1, kind: input, shape index: {}]   ;;  %s3834_s2 = inlined_call_operand.vmem [shape: f32[8,64], index: 2, kind: input, shape index: {}]   ;;  %s3835_s3 = inlined_call_operand.vmem [shape: f32[4,32], index: 3, kind: input, shape index: {}]   ;;  %s3836_s4 = inlined_call_operand.vmem [shape: f32[1,12], index: 4, kind: input, shape index: {}]   ;;  %s3837_s5 = inlined_call_operand.vmem [shape: f32[1,96], index: 5, kind: input, shape index: {}]   ;;  %s3838_s6 = inlined_call_operand.hbm [shape: f32[8,256], index: 6, kind: output, shape index: {}]  }
   0x1   :  { %v24_v0 = vld [vmem:[%s3833_s1] sm:$0xff]  ;;  %v25_v1 = vld [vmem:[%s3833_s1 + $0x8] sm:$0xff]  ;;  %3198 = vmatprep.subr.bf16.mxu1 %v3384_v3  ;;  %v26_v7 = vld [vmem:[%s3833_s1 + $0x10] sm:$0xff] }
   0x2   :  { %v28_v2 = vld [vmem:[%s3833_s1 + $0x20] sm:$0xf]  ;;  %v3437_v4 = vpack.c.bf16 %v25_v1, %v24_v0  ;;  %v33_v6 = vld [vmem:[%s3832_s0 + $0x8] sm:$0xff]  ;;  %v27_v8 = vld [vmem:[%s3833_s1 + $0x18] sm:$0xff] }
   0x3   :  { %2928 = vmatprep.subr.msk.mxu0 %vm72_vm0, %v28_v2  ;;  %v32_v5 = vld [vmem:[%s3832_s0] sm:$0xff] }
   0x4   :  { %2929 = vmatpush3.msk.msra.mxu0 %vm72_vm0, %v28_v2  ;;  %2930 = vmatprep.mubr.msk.f32.mxu0 %vm47_vm1, %v32_v5 }
   0x5   :  { %11 = vsyncpa [#allocation3], 0  ;;  %3200 = vmatpush3.bf16.msra.mxu1 %v3437_v4  ;;  %2931 = vmatmul.mubr.msk.f32.vlgmr.msra.gmra.mrb[0].mxu0 %vm47_vm1, %v33_v6  ;;  %v3456_v9 = vpack.c.bf16 %v27_v8, %v26_v7  ;;  %vm3385_vm2 = vmmov 0   ;;  %v3386_v10 = vmov 0.0   ;;  %v3470_v11 = vld [vmem:[%s3834_s2] sm:$0xff]  ;;  %vm261_vm3 = vcmask 64512  }
   0x6   :  { %3201 = vmatprep.subr.bf16.mxu1 %v3384_v3  ;;  %2950 = vmatprep.mubr.msk.f32.mxu1 %vm3385_vm2, %v3386_v10  ;;  %v3479_v13 = vld [vmem:[%s3836_s4] ss:$0 sm:$0xff]  ;;  %v3302_v19 = vpack.i.bf16 %v25_v1, %v24_v0  ;;  %s3387_s2 = smov 120   ;;  %v3307_v20 = vpack.i.bf16 %v27_v8, %v26_v7  ;;  %v34_v21 = vld [vmem:[%s3832_s0 + $0x10] sm:$0xff]  ;;  %v35_v22 = vld [vmem:[%s3832_s0 + $0x18] sm:$0xff]  ;;  %s3388_s27 = smov 96  }
   0x7   :  { %3204 = vmatprep.subr.bf16.mxu0 %v3384_v3  ;;  %v36_v23 = vld [vmem:[%s3832_s0 + $0x20] sm:$0xff]  ;;  %2933 = vmatprep.mubr.msk.f32.mxu0 %vm47_vm1, %v34_v21  ;;  %v37_v24 = vld [vmem:[%s3832_s0 + $0x28] sm:$0xff]  ;;  %v38_v25 = vld [vmem:[%s3832_s0 + $0x30] sm:$0xff]  ;;  %vm181_vm4 = vcmask 261120   ;;  %s3390_s28 = smov 32   ;;  %vm2728_vm5 = vcmask 785408  }
   0x8   :  { %3303 = vrot.lane.b32.xlu0 %v3302_v19, %s3387_s2  ;;  %v39_v26 = vld [vmem:[%s3832_s0 + $0x38] sm:$0xff]  ;;  %v3516_v27 = vld [vmem:[%s3837_s5] ss:$0 sm:$0xff]  ;;  %vm2726_vm6 = vcmask 523264   ;;  %s3391_s29 = smov [#allocation2]  }
   0x9   :  { %3203 = vmatpush3.bf16.msra.mxu1 %v3456_v9  ;;  %2934 = vmatmul.mubr.msk.f32.gmra.mrb[2].mxu0 %vm47_vm1, %v35_v22  ;;  %v3530_v42 = vld [vmem:[%s3835_s3] sm:$0xf]  ;;  %s3389_s3 = smov 64   ;;  %s2741_s30 = sshll.u32 %s3391_s29, 4  ;;  %s2742_s30 = int_to_ptr.vmem [resolvable:$true] %s2741_s30 }
   0xa   :  { %2953 = vmatprep.subr.mxu1 %v3386_v10  ;;  %2936 = vmatprep.mubr.msk.f32.mxu0 %vm47_vm1, %v36_v23  ;;  %s3360_s7 = scalar_lea.vmem %s2742_s30, 256  ;;  %p3365_p1 = scmp.lt.s32.totalorder %s2742_s30, %s2742_s30 }
   0xb   :  { %p3361_p0 = scmp.ne.s32.totalorder %s2742_s30, %s3360_s7  ;;  %p3366_p2 = scmp.lt.s32.totalorder %s3360_s7, %s3360_s7 }
   0xc   :  { %2951 = vmatmul.mubr.f32.vlgmr.msra.gmra.mrb[0].mxu1 %v3386_v10  ;;  %3308 = vrot.lane.b32.xlu0 %v3307_v20, %s3387_s2 }
   0xd   :  { %2955 = vmatprep.mubr.msk.f32.mxu1 %vm3385_vm2, %v3386_v10  ;;  %2954 = vmatpush3.msra.mxu1 %v3470_v11  ;;  %p3367_p3 = por %p3366_p2, %p3365_p1 }
   0xe   :  { %2969 = vmatprep.subr.mxu1 %v3386_v10  ;;  %2937 = vmatmul.mubr.msk.f32.gmra.mrb[4].mxu0 %vm47_vm1, %v37_v24 }
   0xf   :  { %2939 = vmatprep.mubr.msk.f32.mxu0 %vm47_vm1, %v38_v25  ;;  %p3368_p4 = pnand %p3367_p3, %p3361_p0 }
  0x10   :  { %437 = vrot.lane.b32.xlu0 %v3516_v27, %s3389_s3 }
  0x12   :  { %2940 = vmatmul.mubr.msk.f32.gmra.mrb[6].mxu0 %vm47_vm1, %v39_v26 }
  0x13   :  { %2966 = vmatprep.mubr.msk.f32.mxu0 %vm3385_vm2, %v3386_v10 }
  0x7a   :  { %v3304_v32 = vpop.permute.xlu0 %3303 }
  0x7b   :  { %v3306_v33 = vunpack.i.h.bf16 %v3304_v32  ;;  %v3305_v34 = vunpack.i.l.bf16 %v3304_v32 }
  0x7d   :  { %v3519_v35 = vpack.c.bf16 %v3306_v33, %v3305_v34 }
  0x7e   :  { %v3309_v36 = vpop.permute.xlu0 %3308 }
  0x7f   :  { %3206 = vmatpush3.bf16.msra.mxu0 %v3519_v35  ;;  %v3311_v37 = vunpack.i.h.bf16 %v3309_v36  ;;  %v3310_v38 = vunpack.i.l.bf16 %v3309_v36 }
  0x80   :  { %3207 = vmatprep.subr.bf16.mxu0 %v3384_v3 }
  0x81   :  { %v3523_v39 = vpack.c.bf16 %v3311_v37, %v3310_v38 }
  0x82   :  { %v3563_v56 = vpop.permute.xlu0 %437 }
  0x83   :  { %3209 = vmatpush3.bf16.msra.mxu0 %v3523_v39 }
  0x84   :  { %2985 = vmatprep.subr.mxu0 %v3386_v10 }
  0xd8   :  { %v3474_v12 = vpop.f32.mrb[0].mxu0 }
  0xd9   :  { %v142_v14 = vpop.f32.mrb[1].mxu0  ;;  %v148_v1 = vadd.f32 %v3474_v12, %v3479_v13 }
  0xda   :  { %v143_v15 = vadd.f32 %v3479_v13, %v142_v14 }
  0xdc   :  { %v3537_v45 = vpop.f32.mrb[2].mxu0 }
  0xdd   :  { %v3539_v46 = vpop.f32.mrb[3].mxu0 }
  0xde   :  { %v153_v34 = vadd.f32 %v3479_v13, %v3539_v46 }
  0xdf   :  { %v251_v16 = vpop.f32.mrb[0].mxu1 }
  0xe0   :  { %v252_v17 = vadd.f32 %v251_v16, %v143_v15  ;;  %v2952_v18 = vpop.f32.mrb[1].mxu1 }
  0xe1   :  { %v3541_v47 = vpop.f32.mrb[4].mxu0 }
  0xe2   :  { %2956 = vmatmul.mubr.msk.f32.vlgmr.msra.gmra.mrb[2].mxu1 %vm261_vm3, %v252_v17  ;;  %v3543_v48 = vpop.f32.mrb[5].mxu0 }
  0xe3   :  { %2971 = vmatprep.mubr.msk.f32.mxu1 %vm3385_vm2, %v3386_v10  ;;  %2970 = vmatpush3.msk.msra.mxu1 %vm72_vm0, %v3530_v42 }
  0xe4   :  { %3210 = vmatprep.subr.bf16.mxu1 %v3384_v3 }
  0xe5   :  { %v3545_v49 = vpop.f32.mrb[6].mxu0 }
  0xe6   :  { %v3547_v50 = vpop.f32.mrb[7].mxu0 }
 0x1b5   :  { %v331_v28 = vpop.f32.mrb[2].mxu1 }
 0x1b6   :  { %v332_v29 = vadd.f32 %v3516_v27, %v331_v28  ;;  %v2957_v30 = vpop.f32.mrb[3].mxu1 }
 0x1b8   :  { %v2761_v31 = vmul.f32 -1.442695, %v332_v29 }
 0x1ba   :  { %3312 = vpow2.f32 %v2761_v31 }
 0x1c4   :  { %v3313_v40 = vpop.eup %3312 }
 0x1c5   :  { %v338_v41 = vadd.f32 1.0, %v3313_v40 }
 0x1c7   :  { %3314 = vrcp.f32 %v338_v41 }
 0x1d1   :  { %v3315_v43 = vpop.eup %3314 }
 0x1d2   :  { %v341_v44 = vmul.f32 0.0, %v3315_v43  ;;  %v518_v60 = vsub.f32 1.0, %v3315_v43 }
 0x1d4   :  { %343 = vrot.lane.b32.xlu1 %v341_v44, %s3388_s27  ;;  %v519_v63 = vmul.f32 0.0, %v518_v60 }
 0x1d8   :  { %362 = vrot.lane.b32.xlu1 %v143_v15, %s3387_s2 }
 0x246   :  { %v344_v51 = vpop.permute.xlu1 %343 }
 0x247   :  { %2967 = vmatmul.mubr.msk.f32.vlgmr.msra.gmra.mrb[8].mxu0 %vm181_vm4, %v344_v51 }
 0x248   :  { %2986 = vmatpush3.msra.mxu0 %v3470_v11  ;;  %2987 = vmatprep.mubr.msk.f32.mxu0 %vm3385_vm2, %v3386_v10 }
 0x249   :  { %3216 = vmatprep.subr.bf16.mxu0 %v3384_v3 }
 0x24a   :  { %v363_v52 = vpop.permute.xlu1 %362 }
 0x31a   :  { %v433_v53 = vpop.f32.mrb[8].mxu0 }
 0x31b   :  { %v434_v54 = vadd.f32 %v433_v53, %v363_v52  ;;  %v2968_v55 = vpop.f32.mrb[9].mxu0 }
 0x31d   :  { %2972 = vmatmul.mubr.msk.f32.vlgmr.msra.gmra.mrb[4].mxu1 %vm47_vm1, %v434_v54 }
 0x31e   :  { %3212 = vmatpush3.bf16.msra.mxu1 %v3437_v4  ;;  %2982 = vmatprep.mubr.msk.f32.mxu1 %vm3385_vm2, %v3386_v10 }
 0x31f   :  { %3213 = vmatprep.subr.bf16.mxu1 %v3384_v3 }
 0x322   :  { %3215 = vmatpush3.bf16.msra.mxu1 %v3456_v9 }
 0x323   :  { %3001 = vmatprep.subr.mxu1 %v3386_v10 }
 0x3f0   :  { %v512_v57 = vpop.f32.mrb[4].mxu1 }
 0x3f1   :  { %v513_v58 = vadd.f32 %v512_v57, %v3563_v56  ;;  %v2973_v59 = vpop.f32.mrb[5].mxu1 }
 0x3f3   :  { %3316 = vtanh.f32 %v513_v58 }
 0x3fd   :  { %v3317_v61 = vpop.eup %3316 }
 0x3fe   :  { %v517_v62 = vmul.f32 %v3317_v61, %v3315_v43 }
 0x400   :  { %v3566_v0 = vadd.f32 %v519_v63, %v517_v62 }
 0x402   :  { %673 = vrot.lane.b32.xlu1 %v3566_v0, %s3390_s28  ;;  %2983 = vmatmul.mubr.msk.f32.vlgmr.msra.gmra.mrb[6].mxu1 %vm181_vm4, %v3566_v0 }
 0x403   :  { %3002 = vmatpush3.msk.msra.mxu1 %vm72_vm0, %v3530_v42  ;;  %3003 = vmatprep.mubr.msk.f32.mxu1 %vm3385_vm2, %v3386_v10 }
 0x404   :  { %3222 = vmatprep.subr.bf16.mxu1 %v3384_v3 }
 0x406   :  { %681 = vrot.lane.b32.xlu1 %v148_v1, %s3387_s2 }
 0x474   :  { %v674_v18 = vpop.permute.xlu1 %673 }
 0x478   :  { %v682_v21 = vpop.permute.xlu1 %681 }
 0x4d5   :  { %v590_v2 = vpop.f32.mrb[6].mxu1 }
 0x4d6   :  { %v591_v5 = vadd.f32 %v590_v2, %v148_v1  ;;  %v2984_v6 = vpop.f32.mrb[7].mxu1 }
 0x4d8   :  { %2988 = vmatmul.mubr.msk.f32.vlgmr.msra.gmra.mrb[10].mxu0 %vm261_vm3, %v591_v5 }
 0x4d9   :  { %3218 = vmatpush3.bf16.msra.mxu0 %v3519_v35  ;;  %2998 = vmatprep.mubr.msk.f32.mxu0 %vm3385_vm2, %v3386_v10 }
 0x4da   :  { %3219 = vmatprep.subr.bf16.mxu0 %v3384_v3 }
 0x4dd   :  { %3221 = vmatpush3.bf16.msra.mxu0 %v3523_v39 }
 0x4de   :  { %3017 = vmatprep.subr.mxu0 %v3386_v10 }
 0x5ab   :  { %v663_v7 = vpop.f32.mrb[10].mxu0 }
 0x5ac   :  { %v664_v8 = vadd.f32 %v3516_v27, %v663_v7  ;;  %v2989_v12 = vpop.f32.mrb[11].mxu0 }
 0x5ae   :  { %v2767_v14 = vmul.f32 -1.442695, %v664_v8  ;;  %v158_v8 = vadd.f32 %v3537_v45, %v3479_v13 }
 0x5b0   :  { %3318 = vpow2.f32 %v2767_v14 }
 0x5ba   :  { %v3319_v15 = vpop.eup %3318 }
 0x5bb   :  { %v670_v16 = vadd.f32 1.0, %v3319_v15 }
 0x5bd   :  { %3320 = vrcp.f32 %v670_v16 }
 0x5c7   :  { %v3321_v17 = vpop.eup %3320 }
 0x5c8   :  { %v676_v19 = vmul.f32 %v3321_v17, %v674_v18  ;;  %v831_v29 = vsub.f32 1.0, %v3321_v17 }
 0x5ca   :  { %678 = vrot.lane.b32.xlu0 %v676_v19, %s3388_s27  ;;  %v832_v32 = vmul.f32 %v831_v29, %v3566_v0 }
 0x63c   :  { %v679_v20 = vpop.permute.xlu0 %678 }
 0x63d   :  { %2999 = vmatmul.mubr.msk.f32.vlgmr.msra.gmra.mrb[12].mxu0 %vm181_vm4, %v679_v20 }
 0x63e   :  { %3018 = vmatpush3.msra.mxu0 %v3470_v11  ;;  %3019 = vmatprep.mubr.msk.f32.mxu0 %vm3385_vm2, %v3386_v10 }
 0x63f   :  { %3228 = vmatprep.subr.bf16.mxu0 %v3384_v3 }
 0x710   :  { %v752_v22 = vpop.f32.mrb[12].mxu0 }
 0x711   :  { %v753_v23 = vadd.f32 %v752_v22, %v682_v21  ;;  %v3000_v24 = vpop.f32.mrb[13].mxu0 }
 0x713   :  { %3004 = vmatmul.mubr.msk.f32.vlgmr.msra.gmra.mrb[8].mxu1 %vm47_vm1, %v753_v23 }
 0x714   :  { %3224 = vmatpush3.bf16.msra.mxu1 %v3437_v4  ;;  %3014 = vmatprep.mubr.msk.f32.mxu1 %vm3385_vm2, %v3386_v10 }
 0x715   :  { %3225 = vmatprep.subr.bf16.mxu1 %v3384_v3 }
 0x718   :  { %3227 = vmatpush3.bf16.msra.mxu1 %v3456_v9 }
 0x719   :  { %3033 = vmatprep.subr.mxu1 %v3386_v10 }
 0x7e6   :  { %v825_v25 = vpop.f32.mrb[8].mxu1 }
 0x7e7   :  { %v826_v26 = vadd.f32 %v825_v25, %v3563_v56  ;;  %v3005_v28 = vpop.f32.mrb[9].mxu1 }
 0x7e9   :  { %3322 = vtanh.f32 %v826_v26 }
 0x7f3   :  { %v3323_v30 = vpop.eup %3322 }
 0x7f4   :  { %v830_v31 = vmul.f32 %v3323_v30, %v3321_v17 }
 0x7f6   :  { %v833_v33 = vadd.f32 %v832_v32, %v830_v31 }
 0x7f8   :  { %986 = vrot.lane.b32.xlu0 %v833_v33, %s3390_s28  ;;  %3015 = vmatmul.mubr.msk.f32.vlgmr.msra.gmra.mrb[10].mxu1 %vm181_vm4, %v833_v33 }
 0x7f9   :  { %3034 = vmatpush3.msk.msra.mxu1 %vm72_vm0, %v3530_v42  ;;  %3035 = vmatprep.mubr.msk.f32.mxu1 %vm3385_vm2, %v3386_v10 }
 0x7fa   :  { %3234 = vmatprep.subr.bf16.mxu1 %v3384_v3 }
 0x7fc   :  { %994 = vrot.lane.b32.xlu0 %v153_v34, %s3387_s2 }
 0x86a   :  { %v3621_v53 = vpop.permute.xlu0 %986 }
 0x86e   :  { %v995_v57 = vpop.permute.xlu0 %994 }
 0x8cb   :  { %v903_v36 = vpop.f32.mrb[10].mxu1 }
 0x8cc   :  { %v904_v37 = vadd.f32 %v903_v36, %v153_v34  ;;  %v3016_v38 = vpop.f32.mrb[11].mxu1 }
 0x8ce   :  { %3020 = vmatmul.mubr.msk.f32.vlgmr.msra.gmra.mrb[14].mxu0 %vm261_vm3, %v904_v37 }
 0x8cf   :  { %3230 = vmatpush3.bf16.msra.mxu0 %v3519_v35  ;;  %3030 = vmatprep.mubr.msk.f32.mxu0 %vm3385_vm2, %v3386_v10 }
 0x8d0   :  { %3231 = vmatprep.subr.bf16.mxu0 %v3384_v3 }
 0x8d3   :  { %3233 = vmatpush3.bf16.msra.mxu0 %v3523_v39 }
 0x8d4   :  { %3049 = vmatprep.subr.mxu0 %v3386_v10 }
 0x9a1   :  { %v976_v40 = vpop.f32.mrb[14].mxu0 }
 0x9a2   :  { %v977_v41 = vadd.f32 %v3516_v27, %v976_v40  ;;  %v3021_v43 = vpop.f32.mrb[15].mxu0  ;;  %v163_v40 = vadd.f32 %v3479_v13, %v3543_v48 }
 0x9a4   :  { %v2773_v44 = vmul.f32 -1.442695, %v977_v41 }
 0x9a6   :  { %3324 = vpow2.f32 %v2773_v44 }
 0x9b0   :  { %v3325_v46 = vpop.eup %3324 }
 0x9b1   :  { %v983_v51 = vadd.f32 1.0, %v3325_v46 }
 0x9b3   :  { %3326 = vrcp.f32 %v983_v51 }
 0x9bd   :  { %v3327_v52 = vpop.eup %3326 }
 0x9be   :  { %v989_v54 = vmul.f32 %v3327_v52, %v3621_v53  ;;  %v1144_v1 = vsub.f32 1.0, %v3327_v52 }
 0x9c0   :  { %991 = vrot.lane.b32.xlu1 %v989_v54, %s3388_s27  ;;  %v1145_v6 = vmul.f32 %v1144_v1, %v833_v33 }
 0xa32   :  { %v992_v55 = vpop.permute.xlu1 %991 }
 0xa33   :  { %3031 = vmatmul.mubr.msk.f32.vlgmr.msra.gmra.mrb[16].mxu0 %vm181_vm4, %v992_v55 }
 0xa34   :  { %3050 = vmatpush3.msra.mxu0 %v3470_v11  ;;  %3051 = vmatprep.mubr.msk.f32.mxu0 %vm3385_vm2, %v3386_v10 }
 0xa35   :  { %3240 = vmatprep.subr.bf16.mxu0 %v3384_v3 }
 0xb06   :  { %v1065_v58 = vpop.f32.mrb[16].mxu0 }
 0xb07   :  { %v1066_v59 = vadd.f32 %v1065_v58, %v995_v57  ;;  %v3032_v60 = vpop.f32.mrb[17].mxu0 }
 0xb09   :  { %3036 = vmatmul.mubr.msk.f32.vlgmr.msra.gmra.mrb[12].mxu1 %vm47_vm1, %v1066_v59 }
 0xb0a   :  { %3236 = vmatpush3.bf16.msra.mxu1 %v3437_v4  ;;  %3046 = vmatprep.mubr.msk.f32.mxu1 %vm3385_vm2, %v3386_v10 }
 0xb0b   :  { %3237 = vmatprep.subr.bf16.mxu1 %v3384_v3 }
 0xb0e   :  { %3239 = vmatpush3.bf16.msra.mxu1 %v3456_v9 }
 0xb0f   :  { %3065 = vmatprep.subr.mxu1 %v3386_v10 }
 0xbdc   :  { %v1138_v61 = vpop.f32.mrb[12].mxu1 }
 0xbdd   :  { %v1139_v62 = vadd.f32 %v1138_v61, %v3563_v56  ;;  %v3037_v63 = vpop.f32.mrb[13].mxu1 }
 0xbdf   :  { %3328 = vtanh.f32 %v1139_v62 }
 0xbe9   :  { %v3329_v2 = vpop.eup %3328 }
 0xbea   :  { %v1143_v5 = vmul.f32 %v3329_v2, %v3327_v52 }
 0xbec   :  { %v3638_v7 = vadd.f32 %v1145_v6, %v1143_v5 }
 0xbee   :  { %1299 = vrot.lane.b32.xlu1 %v3638_v7, %s3390_s28  ;;  %3047 = vmatmul.mubr.msk.f32.vlgmr.msra.gmra.mrb[14].mxu1 %vm181_vm4, %v3638_v7 }
 0xbef   :  { %3066 = vmatpush3.msk.msra.mxu1 %vm72_vm0, %v3530_v42  ;;  %3067 = vmatprep.mubr.msk.f32.mxu1 %vm3385_vm2, %v3386_v10 }
 0xbf0   :  { %3246 = vmatprep.subr.bf16.mxu1 %v3384_v3 }
 0xbf2   :  { %1307 = vrot.lane.b32.xlu1 %v158_v8, %s3387_s2 }
 0xc60   :  { %v1300_v22 = vpop.permute.xlu1 %1299 }
 0xc64   :  { %v1308_v25 = vpop.permute.xlu1 %1307 }
 0xcc1   :  { %v1216_v12 = vpop.f32.mrb[14].mxu1 }
 0xcc2   :  { %v1217_v14 = vadd.f32 %v1216_v12, %v158_v8  ;;  %v3048_v15 = vpop.f32.mrb[15].mxu1 }
 0xcc4   :  { %3052 = vmatmul.mubr.msk.f32.vlgmr.msra.gmra.mrb[18].mxu0 %vm261_vm3, %v1217_v14 }
 0xcc5   :  { %3242 = vmatpush3.bf16.msra.mxu0 %v3519_v35  ;;  %3062 = vmatprep.mubr.msk.f32.mxu0 %vm3385_vm2, %v3386_v10 }
 0xcc6   :  { %3243 = vmatprep.subr.bf16.mxu0 %v3384_v3 }
 0xcc9   :  { %3245 = vmatpush3.bf16.msra.mxu0 %v3523_v39 }
 0xcca   :  { %3081 = vmatprep.subr.mxu0 %v3386_v10 }
 0xd97   :  { %v1289_v45 = vpop.f32.mrb[18].mxu0 }
 0xd98   :  { %v1290_v16 = vadd.f32 %v3516_v27, %v1289_v45  ;;  %v3053_v17 = vpop.f32.mrb[19].mxu0 }
 0xd9a   :  { %v2779_v18 = vmul.f32 -1.442695, %v1290_v16  ;;  %v168_v16 = vadd.f32 %v3541_v47, %v3479_v13 }
 0xd9c   :  { %3330 = vpow2.f32 %v2779_v18 }
 0xda6   :  { %v3331_v19 = vpop.eup %3330 }
 0xda7   :  { %v1296_v20 = vadd.f32 1.0, %v3331_v19 }
 0xda9   :  { %3332 = vrcp.f32 %v1296_v20 }
 0xdb3   :  { %v3333_v21 = vpop.eup %3332 }
 0xdb4   :  { %v1302_v23 = vmul.f32 %v3333_v21, %v1300_v22  ;;  %v1457_v33 = vsub.f32 1.0, %v3333_v21 }
 0xdb6   :  { %1304 = vrot.lane.b32.xlu0 %v1302_v23, %s3388_s27  ;;  %v1458_v37 = vmul.f32 %v1457_v33, %v3638_v7 }
 0xe28   :  { %v1305_v24 = vpop.permute.xlu0 %1304 }
 0xe29   :  { %3063 = vmatmul.mubr.msk.f32.vlgmr.msra.gmra.mrb[20].mxu0 %vm181_vm4, %v1305_v24 }
 0xe2a   :  { %3082 = vmatpush3.msra.mxu0 %v3470_v11  ;;  %3083 = vmatprep.mubr.msk.f32.mxu0 %vm3385_vm2, %v3386_v10 }
 0xe2b   :  { %3252 = vmatprep.subr.bf16.mxu0 %v3384_v3 }
 0xefc   :  { %v1378_v26 = vpop.f32.mrb[20].mxu0 }
 0xefd   :  { %v1379_v28 = vadd.f32 %v1378_v26, %v1308_v25  ;;  %v3064_v29 = vpop.f32.mrb[21].mxu0 }
 0xeff   :  { %3068 = vmatmul.mubr.msk.f32.vlgmr.msra.gmra.mrb[16].mxu1 %vm47_vm1, %v1379_v28 }
 0xf00   :  { %3248 = vmatpush3.bf16.msra.mxu1 %v3437_v4  ;;  %3078 = vmatprep.mubr.msk.f32.mxu1 %vm3385_vm2, %v3386_v10 }
 0xf01   :  { %3249 = vmatprep.subr.bf16.mxu1 %v3384_v3 }
 0xf04   :  { %3251 = vmatpush3.bf16.msra.mxu1 %v3456_v9 }
 0xf05   :  { %3097 = vmatprep.subr.mxu1 %v3386_v10 }
 0xfd2   :  { %v1451_v30 = vpop.f32.mrb[16].mxu1 }
 0xfd3   :  { %v1452_v31 = vadd.f32 %v1451_v30, %v3563_v56  ;;  %v3069_v32 = vpop.f32.mrb[17].mxu1 }
 0xfd5   :  { %3334 = vtanh.f32 %v1452_v31 }
 0xfdf   :  { %v3335_v34 = vpop.eup %3334 }
 0xfe0   :  { %v1456_v36 = vmul.f32 %v3335_v34, %v3333_v21 }
 0xfe2   :  { %v3675_v38 = vadd.f32 %v1458_v37, %v1456_v36 }
 0xfe4   :  { %1612 = vrot.lane.b32.xlu0 %v3675_v38, %s3390_s28  ;;  %3079 = vmatmul.mubr.msk.f32.vlgmr.msra.gmra.mrb[18].mxu1 %vm181_vm4, %v3675_v38 }
 0xfe5   :  { %3098 = vmatpush3.msk.msra.mxu1 %vm72_vm0, %v3530_v42  ;;  %3099 = vmatprep.mubr.msk.f32.mxu1 %vm3385_vm2, %v3386_v10 }
 0xfe6   :  { %3258 = vmatprep.subr.bf16.mxu1 %v3384_v3 }
 0xfe8   :  { %1620 = vrot.lane.b32.xlu0 %v163_v40, %s3387_s2 }
0x1056   :  { %v1613_v58 = vpop.permute.xlu0 %1612 }
0x105a   :  { %v1621_v61 = vpop.permute.xlu0 %1620 }
0x10b7   :  { %v1529_v41 = vpop.f32.mrb[18].mxu1 }
0x10b8   :  { %v1530_v43 = vadd.f32 %v1529_v41, %v163_v40  ;;  %v3080_v44 = vpop.f32.mrb[19].mxu1 }
0x10ba   :  { %3084 = vmatmul.mubr.msk.f32.vlgmr.msra.gmra.mrb[22].mxu0 %vm261_vm3, %v1530_v43 }
0x10bb   :  { %3254 = vmatpush3.bf16.msra.mxu0 %v3519_v35  ;;  %3094 = vmatprep.mubr.msk.f32.mxu0 %vm3385_vm2, %v3386_v10 }
0x10bc   :  { %3255 = vmatprep.subr.bf16.mxu0 %v3384_v3 }
0x10bf   :  { %3257 = vmatpush3.bf16.msra.mxu0 %v3523_v39 }
0x10c0   :  { %3113 = vmatprep.subr.mxu0 %v3386_v10 }
0x118d   :  { %v1602_v48 = vpop.f32.mrb[22].mxu0 }
0x118e   :  { %v1603_v46 = vadd.f32 %v3516_v27, %v1602_v48  ;;  %v3085_v51 = vpop.f32.mrb[23].mxu0 }
0x1190   :  { %v2785_v52 = vmul.f32 -1.442695, %v1603_v46  ;;  %v173_v46 = vadd.f32 %v3479_v13, %v3547_v50 }
0x1192   :  { %3336 = vpow2.f32 %v2785_v52 }
0x119c   :  { %v3337_v54 = vpop.eup %3336 }
0x119d   :  { %v1609_v55 = vadd.f32 1.0, %v3337_v54 }
0x119f   :  { %3338 = vrcp.f32 %v1609_v55 }
0x11a9   :  { %v3339_v57 = vpop.eup %3338 }
0x11aa   :  { %v1615_v59 = vmul.f32 %v3339_v57, %v1613_v58  ;;  %v1770_v8 = vsub.f32 1.0, %v3339_v57 }
0x11ac   :  { %1617 = vrot.lane.b32.xlu1 %v1615_v59, %s3388_s27  ;;  %v1771_v15 = vmul.f32 %v1770_v8, %v3675_v38 }
0x121e   :  { %v1618_v60 = vpop.permute.xlu1 %1617 }
0x121f   :  { %3095 = vmatmul.mubr.msk.f32.vlgmr.msra.gmra.mrb[24].mxu0 %vm181_vm4, %v1618_v60 }
0x1220   :  { %3114 = vmatpush3.msra.mxu0 %v3470_v11  ;;  %3115 = vmatprep.mubr.msk.f32.mxu0 %vm3385_vm2, %v3386_v10 }
0x1221   :  { %3264 = vmatprep.subr.bf16.mxu0 %v3384_v3 }
0x12f2   :  { %v1691_v62 = vpop.f32.mrb[24].mxu0 }
0x12f3   :  { %v1692_v63 = vadd.f32 %v1691_v62, %v1621_v61  ;;  %v3096_v1 = vpop.f32.mrb[25].mxu0 }
0x12f5   :  { %3100 = vmatmul.mubr.msk.f32.vlgmr.msra.gmra.mrb[20].mxu1 %vm47_vm1, %v1692_v63 }
0x12f6   :  { %3260 = vmatpush3.bf16.msra.mxu1 %v3437_v4  ;;  %3110 = vmatprep.mubr.msk.f32.mxu1 %vm3385_vm2, %v3386_v10 }
0x12f7   :  { %3261 = vmatprep.subr.bf16.mxu1 %v3384_v3 }
0x12fa   :  { %3263 = vmatpush3.bf16.msra.mxu1 %v3456_v9 }
0x12fb   :  { %3129 = vmatprep.subr.mxu1 %v3386_v10 }
0x13c8   :  { %v1764_v2 = vpop.f32.mrb[20].mxu1 }
0x13c9   :  { %v1765_v5 = vadd.f32 %v1764_v2, %v3563_v56  ;;  %v3101_v6 = vpop.f32.mrb[21].mxu1 }
0x13cb   :  { %3340 = vtanh.f32 %v1765_v5 }
0x13d5   :  { %v3341_v12 = vpop.eup %3340 }
0x13d6   :  { %v1769_v14 = vmul.f32 %v3341_v12, %v3339_v57 }
0x13d8   :  { %v3712_v45 = vadd.f32 %v1771_v15, %v1769_v14 }
0x13da   :  { %1925 = vrot.lane.b32.xlu1 %v3712_v45, %s3390_s28  ;;  %3111 = vmatmul.mubr.msk.f32.vlgmr.msra.gmra.mrb[22].mxu1 %vm181_vm4, %v3712_v45 }
0x13db   :  { %3130 = vmatpush3.msk.msra.mxu1 %vm72_vm0, %v3530_v42  ;;  %3131 = vmatprep.mubr.msk.f32.mxu1 %vm3385_vm2, %v3386_v10 }
0x13dc   :  { %3270 = vmatprep.subr.bf16.mxu1 %v3384_v3 }
0x13de   :  { %1933 = vrot.lane.b32.xlu1 %v168_v16, %s3387_s2 }
0x144c   :  { %v1926_v26 = vpop.permute.xlu1 %1925 }
0x1450   :  { %v1934_v30 = vpop.permute.xlu1 %1933 }
0x14ad   :  { %v1842_v17 = vpop.f32.mrb[22].mxu1 }
0x14ae   :  { %v1843_v18 = vadd.f32 %v1842_v17, %v168_v16  ;;  %v3112_v19 = vpop.f32.mrb[23].mxu1 }
0x14b0   :  { %3116 = vmatmul.mubr.msk.f32.vlgmr.msra.gmra.mrb[26].mxu0 %vm261_vm3, %v1843_v18 }
0x14b1   :  { %3266 = vmatpush3.bf16.msra.mxu0 %v3519_v35  ;;  %3126 = vmatprep.mubr.msk.f32.mxu0 %vm3385_vm2, %v3386_v10 }
0x14b2   :  { %3267 = vmatprep.subr.bf16.mxu0 %v3384_v3 }
0x14b5   :  { %3269 = vmatpush3.bf16.msra.mxu0 %v3523_v39 }
0x14b6   :  { %3145 = vmatprep.subr.mxu0 %v3386_v10 }
0x1583   :  { %v1915_v47 = vpop.f32.mrb[26].mxu0 }
0x1584   :  { %v1916_v20 = vadd.f32 %v3516_v27, %v1915_v47  ;;  %v3117_v21 = vpop.f32.mrb[27].mxu0 }
0x1586   :  { %v2791_v22 = vmul.f32 -1.442695, %v1916_v20 }
0x1588   :  { %3342 = vpow2.f32 %v2791_v22 }
0x1592   :  { %v3343_v23 = vpop.eup %3342 }
0x1593   :  { %v1922_v24 = vadd.f32 1.0, %v3343_v23 }
0x1595   :  { %3344 = vrcp.f32 %v1922_v24 }
0x159f   :  { %v3345_v25 = vpop.eup %3344 }
0x15a0   :  { %v1928_v28 = vmul.f32 %v3345_v25, %v1926_v26  ;;  %v2083_v40 = vsub.f32 1.0, %v3345_v25 }
0x15a2   :  { %1930 = vrot.lane.b32.xlu0 %v1928_v28, %s3388_s27  ;;  %v2084_v44 = vmul.f32 %v2083_v40, %v3712_v45 }
0x1614   :  { %v1931_v29 = vpop.permute.xlu0 %1930 }
0x1615   :  { %3127 = vmatmul.mubr.msk.f32.vlgmr.msra.gmra.mrb[28].mxu0 %vm181_vm4, %v1931_v29 }
0x1616   :  { %3146 = vmatpush3.msra.mxu0 %v3470_v11  ;;  %3147 = vmatprep.mubr.msk.f32.mxu0 %vm3385_vm2, %v3386_v10 }
0x1617   :  { %3276 = vmatprep.subr.bf16.mxu0 %v3384_v3 }
0x16e8   :  { %v2004_v31 = vpop.f32.mrb[28].mxu0 }
0x16e9   :  { %v2005_v32 = vadd.f32 %v2004_v31, %v1934_v30  ;;  %v3128_v33 = vpop.f32.mrb[29].mxu0 }
0x16eb   :  { %3132 = vmatmul.mubr.msk.f32.vlgmr.msra.gmra.mrb[24].mxu1 %vm47_vm1, %v2005_v32 }
0x16ec   :  { %3272 = vmatpush3.bf16.msra.mxu1 %v3437_v4  ;;  %3142 = vmatprep.mubr.msk.f32.mxu1 %vm3385_vm2, %v3386_v10 }
0x16ed   :  { %3273 = vmatprep.subr.bf16.mxu1 %v3384_v3 }
0x16f0   :  { %3275 = vmatpush3.bf16.msra.mxu1 %v3456_v9 }
0x16f1   :  { %3161 = vmatprep.subr.mxu1 %v3386_v10 }
0x17be   :  { %v2077_v34 = vpop.f32.mrb[24].mxu1 }
0x17bf   :  { %v2078_v36 = vadd.f32 %v2077_v34, %v3563_v56  ;;  %v3133_v37 = vpop.f32.mrb[25].mxu1 }
0x17c1   :  { %3346 = vtanh.f32 %v2078_v36 }
0x17cb   :  { %v3347_v41 = vpop.eup %3346 }
0x17cc   :  { %v2082_v43 = vmul.f32 %v3347_v41, %v3345_v25 }
0x17ce   :  { %v2085_v48 = vadd.f32 %v2084_v44, %v2082_v43 }
0x17d0   :  { %2238 = vrot.lane.b32.xlu0 %v2085_v48, %s3390_s28  ;;  %3143 = vmatmul.mubr.msk.f32.vlgmr.msra.gmra.mrb[26].mxu1 %vm181_vm4, %v2085_v48 }
0x17d1   :  { %3162 = vmatpush3.msk.msra.mxu1 %vm72_vm0, %v3530_v42  ;;  %3163 = vmatprep.mubr.msk.f32.mxu1 %vm3385_vm2, %v3386_v10 }
0x17d2   :  { %3282 = vmatprep.subr.bf16.mxu1 %v3384_v3 }
0x17d4   :  { %2246 = vrot.lane.b32.xlu0 %v173_v46, %s3387_s2 }
0x1842   :  { %v3767_v62 = vpop.permute.xlu0 %2238 }
0x1843   :  { %v2730_v41 = vsel %vm181_vm4, %v3712_v45, %v3767_v62 }
0x1846   :  { %v2247_v2 = vpop.permute.xlu0 %2246 }
0x18a3   :  { %v2155_v51 = vpop.f32.mrb[26].mxu1 }
0x18a4   :  { %v2156_v52 = vadd.f32 %v2155_v51, %v173_v46  ;;  %v3144_v54 = vpop.f32.mrb[27].mxu1 }
0x18a6   :  { %3148 = vmatmul.mubr.msk.f32.vlgmr.msra.gmra.mrb[30].mxu0 %vm261_vm3, %v2156_v52 }
0x18a7   :  { %3278 = vmatpush3.bf16.msra.mxu0 %v3519_v35  ;;  %3158 = vmatprep.mubr.msk.f32.mxu0 %vm3385_vm2, %v3386_v10 }
0x18a8   :  { %3279 = vmatprep.subr.bf16.mxu0 %v3384_v3 }
0x18ab   :  { %3281 = vmatpush3.bf16.msra.mxu0 %v3523_v39 }
0x18ac   :  { %3177 = vmatprep.subr.mxu0 %v3386_v10 }
0x1979   :  { %v2228_v50 = vpop.f32.mrb[30].mxu0 }
0x197a   :  { %v2229_v55 = vadd.f32 %v3516_v27, %v2228_v50  ;;  %v3149_v57 = vpop.f32.mrb[31].mxu0 }
0x197c   :  { %v2797_v58 = vmul.f32 -1.442695, %v2229_v55 }
0x197e   :  { %3348 = vpow2.f32 %v2797_v58 }
0x1988   :  { %v3349_v59 = vpop.eup %3348 }
0x1989   :  { %v2235_v60 = vadd.f32 1.0, %v3349_v59 }
0x198b   :  { %3350 = vrcp.f32 %v2235_v60 }
0x1995   :  { %v3351_v61 = vpop.eup %3350 }
0x1996   :  { %v2241_v63 = vmul.f32 %v3351_v61, %v3767_v62  ;;  %v2396_v15 = vsub.f32 1.0, %v3351_v61 }
0x1998   :  { %2243 = vrot.lane.b32.xlu1 %v2241_v63, %s3388_s27  ;;  %v2397_v18 = vmul.f32 %v2396_v15, %v2085_v48 }
0x1a0a   :  { %v2244_v1 = vpop.permute.xlu1 %2243 }
0x1a0b   :  { %3159 = vmatmul.mubr.msk.f32.vlgmr.msra.gmra.mrb[32].mxu0 %vm181_vm4, %v2244_v1 }
0x1a0c   :  { %3178 = vmatpush3.msra.mxu0 %v3470_v11  ;;  %3179 = vmatprep.mubr.msk.f32.mxu0 %vm3385_vm2, %v3386_v10 }
0x1a0d   :  { %3288 = vmatprep.subr.bf16.mxu0 %v3384_v3 }
0x1ade   :  { %v2317_v5 = vpop.f32.mrb[32].mxu0 }
0x1adf   :  { %v2318_v6 = vadd.f32 %v2317_v5, %v2247_v2  ;;  %v3160_v8 = vpop.f32.mrb[33].mxu0 }
0x1ae1   :  { %3164 = vmatmul.mubr.msk.f32.vlgmr.msra.gmra.mrb[28].mxu1 %vm47_vm1, %v2318_v6 }
0x1ae2   :  { %3284 = vmatpush3.bf16.msra.mxu1 %v3437_v4  ;;  %3174 = vmatprep.mubr.msk.f32.mxu1 %vm3385_vm2, %v3386_v10  ;;  %v178_v4 = vadd.f32 %v3545_v49, %v3479_v13 }
0x1ae3   :  { %3285 = vmatprep.subr.bf16.mxu1 %v3384_v3 }
0x1ae6   :  { %3287 = vmatpush3.bf16.msra.mxu1 %v3456_v9 }
0x1ae7   :  { %3193 = vmatprep.subr.mxu1 %v3386_v10 }
0x1bb4   :  { %v2390_v11 = vpop.f32.mrb[28].mxu1 }
0x1bb5   :  { %v2391_v12 = vadd.f32 %v2390_v11, %v3563_v56  ;;  %v3165_v14 = vpop.f32.mrb[29].mxu1 }
0x1bb7   :  { %3352 = vtanh.f32 %v2391_v12 }
0x1bc1   :  { %v3353_v16 = vpop.eup %3352 }
0x1bc2   :  { %v2395_v17 = vmul.f32 %v3353_v16, %v3351_v61 }
0x1bc4   :  { %v2398_v19 = vadd.f32 %v2397_v18, %v2395_v17 }
0x1bc6   :  { %2551 = vrot.lane.b32.xlu1 %v2398_v19, %s3390_s28  ;;  %3175 = vmatmul.mubr.msk.f32.vlgmr.msra.gmra.mrb[30].mxu1 %vm181_vm4, %v2398_v19 }
0x1bc7   :  { %3194 = vmatpush3.msk.msra.mxu1 %vm72_vm0, %v3530_v42  ;;  %3195 = vmatprep.mubr.msk.f32.mxu1 %vm3385_vm2, %v3386_v10 }
0x1bca   :  { %2559 = vrot.lane.b32.xlu1 %v178_v4, %s3387_s2 }
0x1bce   :  { %2718 = vrot.lane.b32.xlu1 %v2398_v19, %s3389_s3 }
0x1c38   :  { %v2552_v25 = vpop.permute.xlu1 %2551 }
0x1c99   :  { %v2468_v9 = vpop.f32.mrb[30].mxu1 }
0x1c9a   :  { %v2469_v47 = vadd.f32 %v2468_v9, %v178_v4  ;;  %v3176_v20 = vpop.f32.mrb[31].mxu1 }
0x1c9c   :  { %3180 = vmatmul.mubr.msk.f32.vlgmr.msra.gmra.mrb[34].mxu0 %vm261_vm3, %v2469_v47 }
0x1c9d   :  { %3290 = vmatpush3.bf16.msra.mxu0 %v3519_v35  ;;  %3190 = vmatprep.mubr.msk.f32.mxu0 %vm3385_vm2, %v3386_v10 }
0x1c9e   :  { %3291 = vmatprep.subr.bf16.mxu0 %v3384_v3 }
0x1ca1   :  { %3293 = vmatpush3.bf16.msra.mxu0 %v3523_v39 }
0x1d6f   :  { %v2541_v42 = vpop.f32.mrb[34].mxu0 }
0x1d70   :  { %v2542_v13 = vadd.f32 %v3516_v27, %v2541_v42  ;;  %v3181_v49 = vpop.f32.mrb[35].mxu0  ;;  %v2725_v27 = vsel %vm181_vm4, %v3566_v0, %v3621_v53 }
0x1d72   :  { %v2803_v21 = vmul.f32 -1.442695, %v2542_v13 }
0x1d74   :  { %3354 = vpow2.f32 %v2803_v21 }
0x1d7e   :  { %v3355_v22 = vpop.eup %3354 }
0x1d7f   :  { %v2548_v23 = vadd.f32 1.0, %v3355_v22 }
0x1d81   :  { %3356 = vrcp.f32 %v2548_v23 }
0x1d8b   :  { %v3357_v24 = vpop.eup %3356 }
0x1d8c   :  { %v2554_v26 = vmul.f32 %v3357_v24, %v2552_v25  ;;  %v2709_v34 = vsub.f32 1.0, %v3357_v24 }
0x1d8e   :  { %2556 = vrot.lane.b32.xlu0 %v2554_v26, %s3388_s27  ;;  %v2710_v36 = vmul.f32 %v2709_v34, %v2398_v19 }
0x1d92   :  { %2712 = vrot.lane.b32.xlu0 %v3638_v7, %s3389_s3  ;;  %v2560_v7 = vpop.permute.xlu1 %2559 }
0x1d96   :  { %2715 = vrot.lane.b32.xlu0 %v3675_v38, %s3388_s27  ;;  %v2719_v40 = vpop.permute.xlu1 %2718 }
0x1d97   :  { %v2731_v43 = vsel %vm2726_vm6, %v2730_v41, %v2719_v40 }
0x1e00   :  { %v2557_v3 = vpop.permute.xlu0 %2556 }
0x1e01   :  { %3191 = vmatmul.mubr.msk.f32.vlgmr.msra.gmra.mrb[36].mxu0 %vm181_vm4, %v2557_v3 }
0x1e04   :  { %v2713_v10 = vpop.permute.xlu0 %2712 }
0x1e05   :  { %v2727_v35 = vsel %vm2726_vm6, %v2725_v27, %v2713_v10 }
0x1e08   :  { %v2716_v39 = vpop.permute.xlu0 %2715 }
0x1e09   :  { %v2729_v28 = vsel %vm2728_vm5, %v2727_v35, %v2716_v39 }
0x1e0a   :  { %2733 = vst [vmem:[#allocation2] sm:$0xff] %v2729_v28 }
0x1ed4   :  { %v2630_v29 = vpop.f32.mrb[36].mxu0 }
0x1ed5   :  { %v2631_v30 = vadd.f32 %v2630_v29, %v2560_v7  ;;  %v3192_v38 = vpop.f32.mrb[37].mxu0 }
0x1ed7   :  { %3196 = vmatmul.mubr.msk.f32.vlgmr.msra.gmra.mrb[32].mxu1 %vm47_vm1, %v2631_v30 }
0x1faa   :  { %v2703_v31 = vpop.f32.mrb[32].mxu1 }
0x1fab   :  { %v2704_v32 = vadd.f32 %v2703_v31, %v3563_v56  ;;  %v3197_v33 = vpop.f32.mrb[33].mxu1 }
0x1fad   :  { %3358 = vtanh.f32 %v2704_v32 }
0x1fb7   :  { %v3359_v0 = vpop.eup %3358 }
0x1fb8   :  { %v2708_v53 = vmul.f32 %v3359_v0, %v3357_v24 }
0x1fba   :  { %v2711_v37 = vadd.f32 %v2710_v36, %v2708_v53 }
0x1fbc   :  { %2722 = vrot.lane.b32.xlu1 %v2711_v37, %s3388_s27 }
0x202e   :  { %v2723_v44 = vpop.permute.xlu1 %2722 }
0x202f   :  { %v2732_v56 = vsel %vm2728_vm5, %v2731_v43, %v2723_v44 }
0x2030   :  { %2734 = vst [vmem:[#allocation2 + $0x8] sm:$0xff] %v2732_v56 }
0x2031   :  { %3371 = shalt.err (!%p3368_p4)
}
0x2032   :  { %s3372_s10 = scalar_lea.hbm %s3838_s6, 256 }
0x2033   :  { %p3373_p5 = scmp.ne.s32.totalorder %s3838_s6, %s3372_s10  ;;  %p3376_p6 = scmp.lt.u32.totalorder %s3372_s10, %s3838_s6 }
0x2035   :  { %p3378_p7 = pnand %p3376_p6, %p3373_p5 }
0x2037   :  { %3381 = shalt.err (!%p3378_p7)
}
0x2038   :  { %2744 = dma.vmem_to_hbm [thread:$0]  %s2742_s30, 256, %s3838_s6, [#allocation3]  }
0x2039   :  { %3382 = dma.done.wait [#allocation3], 256  }
0x203a   :  { %3383 = vsyncadd [#allocation3], 4294967040 }
0x203b   :  { %2748 = vsyncpa [#allocation3], 1 }

</bundles_post_ra>
